<compile_context>
chip_gen: v7x
topology: tpu7x:2x2x1
jax: 0.10.0
libtpu: 0.0.40
codegen_flags: <defaults>
</compile_context>

<pallas_src>
import jax
import jax.numpy as jnp
from jax.experimental import pallas as pl
from jax.experimental.pallas import tpu as pltpu


# ----------------------------- kernel ---------------------------------------


def _noise_add_kernel(x_ref, n_ref, w_ref, o_ref):
    """x_ref: [1, C, T], n_ref: [1, 1, T], w_ref: [1, C, 1], o_ref: [1, C, T].

    Broadcasts the per-channel weight along lanes and the per-pixel noise
    along sublanes: out = x + w * n. Pure VPU work, lane axis = spatial.
    """
    o_ref[...] = x_ref[...] + w_ref[...] * n_ref[...]


# ----------------------------- wrapper ---------------------------------------


def _hw_tile(hw, c, bytes_budget=4 << 20):
    """Lane-dense spatial tile: multiple of 128 that divides HW and keeps a
    (C, tile) f32 block under the VMEM budget. Falls back to the full extent
    (always legal) when HW is not a multiple of 128."""
    if hw % 128 != 0:
        return hw
    max_lanes = max(1, bytes_budget // (4 * max(c, 1) * 128))
    tile = min(hw, max_lanes * 128)
    while hw % tile != 0:
        tile -= 128
    return tile


def noise_layer(x, weight, noise=None, *, rng_key=None):
    """NoiseLayer.forward.

    x      : [B, C, H, W]  (NCHW, consumed directly)
    weight : [C]           per-channel noise weight
    noise  : [B, 1, H', W'] or None (None -> sampled from rng_key)
    """
    B, C, H, W = x.shape

    if noise is None:
        if rng_key is None:
            raise ValueError("noise_layer: need `noise` or `rng_key`")
        # TODO(synk): could instead generate in-kernel via pltpu.prng_seed +
        # pltpu.stateful_normal to skip this HBM array entirely.
        noise = jax.random.normal(rng_key, (B, 1, H, W), x.dtype)
    if noise.shape[-2:] != (H, W):
        # F.interpolate(mode='bilinear', align_corners=False) equivalent
        # (wrapper-side glue, not a Pallas kernel).
        noise = jax.image.resize(
            noise, (noise.shape[0], noise.shape[1], H, W),
            method="bilinear", antialias=False)

    HW = H * W
    x2 = x.reshape(B, C, HW)                       # free reshape (contiguous)
    n2 = noise.reshape(B, 1, HW).astype(x.dtype)   # lane axis = HW, not 1
    w2 = weight.reshape(1, C, 1).astype(x.dtype)

    tile = _hw_tile(HW, C)
    grid = (B, HW // tile)

    out = pl.pallas_call(
        _noise_add_kernel,
        out_shape=jax.ShapeDtypeStruct((B, C, HW), x.dtype),
        grid=grid,
        in_specs=[
            pl.BlockSpec((1, C, tile), lambda b, j: (b, 0, j)),
            pl.BlockSpec((1, 1, tile), lambda b, j: (b, 0, j)),
            pl.BlockSpec((1, C, 1), lambda b, j: (0, 0, 0)),
        ],
        out_specs=pl.BlockSpec((1, C, tile), lambda b, j: (b, 0, j)),
        compiler_params=pltpu.CompilerParams(
            dimension_semantics=("parallel", "parallel")),
    )(x2, n2, w2)
    return out.reshape(B, C, H, W)


# ------------------------------- main ----------------------------------------


if __name__ == "__main__":
    B, C, H, W = 2, 4, 16, 16

    key = jax.random.PRNGKey(0)
    kx, kw, kn = jax.random.split(key, 3)

    x = jax.random.normal(kx, (B, C, H, W), jnp.float32)
    # The PyTorch module initializes weight to zeros; use a nonzero weight so
    # the noise path is actually exercised numerically.
    weight = 0.1 * jax.random.normal(kw, (C,), jnp.float32)
    # per-pixel noise, constant over channels (PyTorch layout [B, 1, H, W])
    noise = jax.random.normal(kn, (B, 1, H, W), jnp.float32)

    fwd = jax.jit(noise_layer)
    out = jax.block_until_ready(fwd(x, weight, noise))

    # pure-JAX reference of the PyTorch forward
    ref = x + weight.reshape(1, C, 1, 1) * noise

    assert out.shape == (B, C, H, W), out.shape
    assert bool(jnp.all(jnp.isfinite(out)))
    assert bool(jnp.allclose(out, ref, atol=1e-6, rtol=1e-6))
    print("KERNEL_OK")
</pallas_src>

<mosaic_0001>
module attributes {stable_mosaic.version = 11 : i64} {
  func.func @_noise_add_kernel(%arg0: i32, %arg1: i32, %arg2: memref<1x4x256xf32, #tpu.memory_space<vmem>>, %arg3: memref<1x1x256xf32, #tpu.memory_space<vmem>>, %arg4: memref<1x4x1xf32, #tpu.memory_space<vmem>>, %arg5: memref<1x4x256xf32, #tpu.memory_space<vmem>>) attributes {dimension_semantics = [#tpu.dimension_semantics<parallel>, #tpu.dimension_semantics<parallel>], iteration_bounds = array<i64: 2, 1>, scalar_prefetch = 0 : i64, scratch_operands = 0 : i64, tpu.core_type = #tpu.core_type<tc>, window_params = [{transform_indices = @transform_0, window_bounds = array<i64: 1, 4, 256>}, {transform_indices = @transform_1, window_bounds = array<i64: 1, 1, 256>}, {pipeline_mode = #tpu.pipeline_mode<synchronous>, transform_indices = @transform_2, window_bounds = array<i64: 1, 4, 1>}, {transform_indices = @transform_3, window_bounds = array<i64: 1, 4, 256>}]} {
    %c0 = arith.constant 0 : index
    %c0_0 = arith.constant 0 : index
    %c0_1 = arith.constant 0 : index
    %0 = vector.load %arg2[%c0, %c0_0, %c0_1] : memref<1x4x256xf32, #tpu.memory_space<vmem>>, vector<1x4x256xf32>
    %c0_2 = arith.constant 0 : index
    %c0_3 = arith.constant 0 : index
    %c0_4 = arith.constant 0 : index
    %1 = vector.load %arg4[%c0_2, %c0_3, %c0_4] : memref<1x4x1xf32, #tpu.memory_space<vmem>>, vector<1x4x1xf32>
    %c0_5 = arith.constant 0 : index
    %c0_6 = arith.constant 0 : index
    %c0_7 = arith.constant 0 : index
    %2 = vector.load %arg3[%c0_5, %c0_6, %c0_7] : memref<1x1x256xf32, #tpu.memory_space<vmem>>, vector<1x1x256xf32>
    %3 = vector.broadcast %1 : vector<1x4x1xf32> to vector<1x4x256xf32>
    %4 = vector.broadcast %2 : vector<1x1x256xf32> to vector<1x4x256xf32>
    %5 = arith.mulf %3, %4 : vector<1x4x256xf32>
    %6 = arith.addf %0, %5 : vector<1x4x256xf32>
    %c0_8 = arith.constant 0 : index
    %c0_9 = arith.constant 0 : index
    %c0_10 = arith.constant 0 : index
    %7 = vector.load %arg5[%c0_8, %c0_9, %c0_10] : memref<1x4x256xf32, #tpu.memory_space<vmem>>, vector<1x4x256xf32>
    tpu.vector_store %arg5[%c0_8, %c0_9, %c0_10], %6 {strides = array<i32>} : memref<1x4x256xf32, #tpu.memory_space<vmem>>, vector<1x4x256xf32>,
    return
  }
  func.func @transform_0(%arg0: i32, %arg1: i32) -> (i32, i32, i32) {
    %c0_i32 = arith.constant 0 : i32
    %c0_i32_0 = arith.constant 0 : i32
    return %arg0, %c0_i32, %arg1 : i32, i32, i32
  }
  func.func @transform_1(%arg0: i32, %arg1: i32) -> (i32, i32, i32) {
    %c0_i32 = arith.constant 0 : i32
    %c0_i32_0 = arith.constant 0 : i32
    return %arg0, %c0_i32, %arg1 : i32, i32, i32
  }
  func.func @transform_2(%arg0: i32, %arg1: i32) -> (i32, i32, i32) {
    %c0_i32 = arith.constant 0 : i32
    %c0_i32_0 = arith.constant 0 : i32
    %c0_i32_1 = arith.constant 0 : i32
    %c0_i32_2 = arith.constant 0 : i32
    return %c0_i32, %c0_i32_0, %c0_i32_1 : i32, i32, i32
  }
  func.func @transform_3(%arg0: i32, %arg1: i32) -> (i32, i32, i32) {
    %c0_i32 = arith.constant 0 : i32
    %c0_i32_0 = arith.constant 0 : i32
    return %arg0, %c0_i32, %arg1 : i32, i32, i32
  }
}

</mosaic_0001>

<bundles_post_ra>
// kernel: noise_layer.1
= control target key start
LH: loop header
LB: loop body
LE: loop exit
PB: predicated region body
PF: predicated region fallthrough
CT: control target
= control target key end

     0   :  { %s457_s12 = smov 0   ;;  %s459_s13 = smov 0   ;;  %s496_s0 = inlined_call_operand.vmem [shape: f32[2,4,256], index: 0, kind: input, shape index: {}]   ;;  %s497_s1 = inlined_call_operand.vmem [shape: f32[2,1,256], index: 1, kind: input, shape index: {}]   ;;  %s498_s2 = inlined_call_operand.vmem [shape: f32[1,4,1], index: 2, kind: input, shape index: {}]   ;;  %s499_s3 = inlined_call_operand.vmem [shape: f32[2,4,256], index: 3, kind: output, shape index: {}]  }
   0x1   :  { %s461_s14 = smov 0  }
   0x2 LB: > { %s25_s15 = sadd.s32 1, %s430_s13  ;;  %p376_p0 = scmp.ge.s32.totalorder %s434_s14, 1  ;;  %s434_s14 = sphi %s461_s14, %s13_s14   ;;  %s430_s13 = sphi %s459_s13, %s501_s13   ;;  %s426_s12 = sphi %s457_s12, %s500_s12  }
   0x3   : > { %p27_p1 = scmp.ge.s32.totalorder %s25_s15, 2  ;;  %p174_p2 = scmp.lt.s32.totalorder %s434_s14, 3 }
   0x5   : > { %s503_s15 = smov (%p27_p1, %s25_s15), 0  ;;  %p175_p3 = pnand %p376_p0, %p174_p2 }
   0x6   : > { %v244_v0 = vld [vmem:[%s498_s2] sm:$0xf] (!%p175_p3)  ;;  %v436_v1 = vmov (!%p175_p3), 0   ;;  %p215_p4 = scmp.lt.s32.totalorder (!%p175_p3), %s426_s12, 1  ;;  %v252_v2 = vlaneseq (!%p175_p3) }
   0x7   : > { %178 = sbr.rel (%p175_p3) target bundleno = 143 (0x8f), region = 32  ;;  %411 = vset.pattern.permute.xlu0 (!%p175_p3), %v436_v1 }
   0x8   : > { %248 = vperm.xlu0 (!%p175_p3), %411, %v244_v0   ;;  %v253_v3 = vshrl.u32 (!%p175_p3), %v252_v2, 7 }
   0xa   : > { %v254_v4 = vsub.s32 (!%p175_p3), 0, %v253_v3  ;;  %v258_v5 = vsub.s32 (!%p175_p3), 1, %v253_v3 }
   0xe   : > { %s505_s12 = smov (!%p215_p4, %s426_s12), 1 }
   0xf   : > { %s379_s18 = sshll.u32 %s505_s12, 1  ;;  %s384_s22 = sshll.u32 %s505_s12, 3 }
  0x10   : > { %s231_s21 = scalar_lea.vmem %s497_s1, %s379_s18  ;;  %s222_s25 = scalar_lea.vmem %s496_s0, %s384_s22 }
  0x11   : > { %v245_v6 = vld [vmem:[%s231_s21] sm:$0x3]  ;;  %s241_s28 = scalar_lea.vmem %s499_s3, %s384_s22 }
  0x12   : > { %v255_v7 = vrot.slane %v245_v6, %v254_v4  ;;  %v259_v8 = vrot.slane %v245_v6, %v258_v5  ;;  %v243_v12 = vld [vmem:[%s222_s25] sm:$0xff] }
  0x87   : > { %v249_v9 = vpop.permute.xlu0 %248 }
  0x88   : > { %v262_v10 = vmul.f32 %v255_v7, %v249_v9  ;;  %v263_v11 = vmul.f32 %v259_v8, %v249_v9 }
  0x8a   : > { %v266_v13 = vcombine.low %v262_v10, %v263_v11 }
  0x8c   : > { %v268_v14 = vadd.f32 %v266_v13, %v243_v12 }
  0x8e   : > { %269 = vst [vmem:[%s241_s28] sm:$0xff] %v268_v14 }
  0x8f PF: > { %s13_s14 = sadd.s32 1, %s434_s14   ;;  %s500_s12 = smov %s430_s13 }
  0x90   : > { %p10_p5 = scmp.ge.s32.totalorder %s13_s14, 4   ;;  %s501_s13 = smov %s503_s15 }
  0x92   :  { %12 = sbr.rel (!%p10_p5) target bundleno = 2 (0x2), region = 65 }

</bundles_post_ra>
